<compile_context>
chip_gen: v6e
topology: v6e:2x2x1
jax: 0.10.0
libtpu: 0.0.40
codegen_flags: <defaults>
</compile_context>

<pallas_src>
import functools

import numpy as np
import jax
import jax.numpy as jnp
from jax.experimental import pallas as pl
from jax.experimental.pallas import tpu as pltpu


def _ha_loss_kernel(cam_ref, sam_ref, out_ref, *, num_classes, map_elems):
    # cam_ref / sam_ref: (RB, K, M) blocks in VMEM (RB images, K class maps of
    # M = H*W elements each).  out_ref: (RB, 8, 128) lane-dense scalar tiles.
    cam = cam_ref[...]
    sam = sam_ref[...]

    # cam_map[np.isnan(cam_map)] = 0 ; sam_mask[np.isnan(sam_mask)] = 0
    cam = jnp.where(cam == cam, cam, jnp.float32(0.0))
    sam = jnp.where(sam == sam, sam, jnp.float32(0.0))

    # Four per-map reductions (the only full-map work besides the NaN scrubs and
    # one elementwise multiply).
    mx = jnp.max(cam, axis=-1, keepdims=True)                    # (RB, K, 1)
    mx = jnp.where(mx == 0.0, jnp.float32(1e-7), mx)             # max==0 -> 1e-7
    s_cam = jnp.sum(cam, axis=-1, keepdims=True)                 # (RB, K, 1)
    s_sam = jnp.sum(sam, axis=-1, keepdims=True)                 # (RB, K, 1)
    dot = jnp.sum(cam * sam, axis=-1, keepdims=True)             # (RB, K, 1)

    inv_mx = 1.0 / mx
    li_num = s_sam - dot * inv_mx           # == sum((1 - cam/mx) * sam)
    lo_num = (s_cam - dot) * inv_mx         # == sum((cam/mx) * (1 - sam))

    inter_area = s_sam
    outer_area = jnp.float32(map_elems) - s_sam

    # loss_inter = li_num / inter_area  if inter_area != 0 else li_num
    loss_inter = jnp.where(
        inter_area != 0.0,
        li_num / jnp.where(inter_area != 0.0, inter_area, jnp.float32(1.0)),
        li_num,
    )
    # loss_outer = lo_num / outer_area  if outer_area != 0 else lo_num
    loss_outer = jnp.where(
        outer_area != 0.0,
        lo_num / jnp.where(outer_area != 0.0, outer_area, jnp.float32(1.0)),
        lo_num,
    )

    per_map = loss_inter + loss_outer                            # (RB, K, 1)
    # loss_calculator: total over classes / num_images (== num_classes slots)
    per_image = jnp.sum(per_map, axis=1, keepdims=True) / jnp.float32(num_classes)

    # Lane-dense scalar writeback: one (8,128) tile per image, unmasked stores.
    out_ref[...] = jnp.broadcast_to(per_image, out_ref.shape).astype(jnp.float32)


def ha_loss(cam_maps, sam_masks, *, block_batch=None):
    """Pallas implementation of HALossGenerator.forward's loss reduction.

    cam_maps, sam_masks: float32 [B, K, H, W]  (batch, class-slot, height, width),
    the dense-tensor analogue of the per-image {class: HxW map} dicts.
    Returns scalar:  mean_b( mean_k( combined_loss(b, k) ) ),
    matching `loss_calculator` (/num_classes) followed by forward's (/batchsize).
    """
    B, K, H, W = cam_maps.shape
    M = H * W

    # Lane-dense flattening of each map (contiguous reshape, no data movement).
    cam = cam_maps.reshape(B, K, M).astype(jnp.float32)
    sam = sam_masks.reshape(B, K, M).astype(jnp.float32)

    # Pick how many whole images (all K maps) to process per grid step:
    # target <= ~2 MiB per input block so 2 inputs x 2 pipeline buffers stays
    # well under the default scoped-VMEM limit on every TPU generation.
    if block_batch is None:
        bytes_per_image = K * M * 4
        rb = max(1, min(B, (2 * 1024 * 1024) // max(bytes_per_image, 1)))
        while B % rb != 0:   # keep clean tiling (no partial blocks)
            rb -= 1
    else:
        rb = block_batch

    grid = (B // rb,)

    kernel = functools.partial(_ha_loss_kernel, num_classes=K, map_elems=M)

    per_image_tiles = pl.pallas_call(
        kernel,
        out_shape=jax.ShapeDtypeStruct((B, 8, 128), jnp.float32),
        grid=grid,
        in_specs=[
            # Last two block dims (K, M) equal the full array dims -> no (8,128)
            # divisibility requirement; M is lane-dense whenever H*W % 128 == 0.
            pl.BlockSpec((rb, K, M), lambda b: (b, 0, 0)),
            pl.BlockSpec((rb, K, M), lambda b: (b, 0, 0)),
        ],
        out_specs=pl.BlockSpec((rb, 8, 128), lambda b: (b, 0, 0)),
        compiler_params=pltpu.CompilerParams(
            # Batch-block axis is fully independent -> shard across TCs on v7x.
            dimension_semantics=("parallel",),
        ),
    )(cam, sam)

    per_image = per_image_tiles[:, 0, 0]          # (B,) per-image losses
    return jnp.mean(per_image)                    # forward: / batchsize


def _reference_loss(cam_maps, sam_masks):
    """Pure-numpy replica of loss_calculator + forward averaging (verification)."""
    cam_maps = np.asarray(cam_maps, dtype=np.float32)
    sam_masks = np.asarray(sam_masks, dtype=np.float32)
    B, K, _, _ = cam_maps.shape
    total = 0.0
    for b in range(B):
        per_img = 0.0
        for k in range(K):
            cam = cam_maps[b, k].copy()
            cam[np.isnan(cam)] = 0
            mx = np.max(cam)
            if mx == 0:
                mx = 1e-7
            cam = cam / mx
            sam = sam_masks[b, k].copy()
            sam[np.isnan(sam)] = 0
            inter = np.sum(sam)
            outer = np.sum(1 - sam)
            li = np.sum((1 - cam) * sam) / inter if inter != 0 else np.sum((1 - cam) * sam)
            lo = np.sum(cam * (1 - sam)) / outer if outer != 0 else np.sum(cam * (1 - sam))
            per_img += li + lo
        total += per_img / K
    return total / B


if __name__ == "__main__":
    # NOTE: HALossGenerator has no local learnable parameters (its submodules are
    # frozen external models), so there is nothing to initialize beyond the inputs.
    key = jax.random.PRNGKey(0)
    B, K, H, W = 2, 4, 16, 16
    k_cam, k_sam = jax.random.split(key)

    cam_maps = jax.random.uniform(k_cam, (B, K, H, W), dtype=jnp.float32)
    # exercise the NaN-scrub path
    cam_maps = cam_maps.at[0, 0, 3, 5].set(jnp.nan)

    sam_masks = (jax.random.uniform(k_sam, (B, K, H, W)) > 0.5).astype(jnp.float32)
    # exercise the inter_area == 0 branch (empty SAM mask for one class)
    sam_masks = sam_masks.at[1, 2].set(0.0)

    loss = ha_loss(cam_maps, sam_masks)
    loss = jax.block_until_ready(loss)

    ref = _reference_loss(cam_maps, sam_masks)
    assert np.allclose(np.asarray(loss), ref, rtol=1e-5, atol=1e-5), (loss, ref)

    print("KERNEL_OK")
</pallas_src>

<mosaic_0001>
module attributes {stable_mosaic.version = 11 : i64} {
  func.func @_ha_loss_kernel(%arg0: i32, %arg1: memref<2x4x256xf32, #tpu.memory_space<vmem>>, %arg2: memref<2x4x256xf32, #tpu.memory_space<vmem>>, %arg3: memref<2x8x128xf32, #tpu.memory_space<vmem>>) attributes {dimension_semantics = [#tpu.dimension_semantics<parallel>], iteration_bounds = array<i64: 1>, scalar_prefetch = 0 : i64, scratch_operands = 0 : i64, tpu.core_type = #tpu.core_type<tc>, window_params = [{transform_indices = @transform_0, window_bounds = array<i64: 2, 4, 256>}, {transform_indices = @transform_1, window_bounds = array<i64: 2, 4, 256>}, {transform_indices = @transform_2, window_bounds = array<i64: 2, 8, 128>}]} {
    %c0 = arith.constant 0 : index
    %c0_0 = arith.constant 0 : index
    %c0_1 = arith.constant 0 : index
    %0 = vector.load %arg1[%c0, %c0_0, %c0_1] : memref<2x4x256xf32, #tpu.memory_space<vmem>>, vector<2x4x256xf32>
    %c0_2 = arith.constant 0 : index
    %c0_3 = arith.constant 0 : index
    %c0_4 = arith.constant 0 : index
    %1 = vector.load %arg2[%c0_2, %c0_3, %c0_4] : memref<2x4x256xf32, #tpu.memory_space<vmem>>, vector<2x4x256xf32>
    %2 = arith.cmpf oeq, %0, %0 : vector<2x4x256xf32>
    %cst = arith.constant 0.000000e+00 : f32
    %3 = vector.broadcast %cst : f32 to vector<2x4x256xf32>
    %4 = arith.select %2, %0, %3 : vector<2x4x256xi1>, vector<2x4x256xf32>
    %5 = arith.cmpf oeq, %1, %1 : vector<2x4x256xf32>
    %cst_5 = arith.constant 0.000000e+00 : f32
    %6 = vector.broadcast %cst_5 : f32 to vector<2x4x256xf32>
    %7 = arith.select %5, %1, %6 : vector<2x4x256xi1>, vector<2x4x256xf32>
    %cst_6 = arith.constant dense<0xFF800000> : vector<2x4xf32>
    %8 = vector.multi_reduction <maximumf>, %4, %cst_6 [2] : vector<2x4x256xf32> to vector<2x4xf32>
    %9 = vector.shape_cast %8 : vector<2x4xf32> to vector<2x4x1xf32>
    %cst_7 = arith.constant 0.000000e+00 : f32
    %10 = vector.broadcast %cst_7 : f32 to vector<2x4x1xf32>
    %11 = arith.cmpf oeq, %9, %10 : vector<2x4x1xf32>
    %cst_8 = arith.constant 1.000000e-07 : f32
    %12 = vector.broadcast %cst_8 : f32 to vector<2x4x1xf32>
    %13 = arith.select %11, %12, %9 : vector<2x4x1xi1>, vector<2x4x1xf32>
    %cst_9 = arith.constant dense<0.000000e+00> : vector<2x4xf32>
    %14 = vector.multi_reduction <add>, %4, %cst_9 [2] : vector<2x4x256xf32> to vector<2x4xf32>
    %15 = vector.shape_cast %14 : vector<2x4xf32> to vector<2x4x1xf32>
    %cst_10 = arith.constant dense<0.000000e+00> : vector<2x4xf32>
    %16 = vector.multi_reduction <add>, %7, %cst_10 [2] : vector<2x4x256xf32> to vector<2x4xf32>
    %17 = vector.shape_cast %16 : vector<2x4xf32> to vector<2x4x1xf32>
    %18 = arith.mulf %4, %7 : vector<2x4x256xf32>
    %cst_11 = arith.constant dense<0.000000e+00> : vector<2x4xf32>
    %19 = vector.multi_reduction <add>, %18, %cst_11 [2] : vector<2x4x256xf32> to vector<2x4xf32>
    %20 = vector.shape_cast %19 : vector<2x4xf32> to vector<2x4x1xf32>
    %cst_12 = arith.constant 1.000000e+00 : f32
    %21 = vector.broadcast %cst_12 : f32 to vector<2x4x1xf32>
    %22 = arith.divf %21, %13 : vector<2x4x1xf32>
    %23 = arith.mulf %20, %22 : vector<2x4x1xf32>
    %24 = arith.subf %17, %23 : vector<2x4x1xf32>
    %25 = arith.subf %15, %20 : vector<2x4x1xf32>
    %26 = arith.mulf %25, %22 : vector<2x4x1xf32>
    %cst_13 = arith.constant 2.560000e+02 : f32
    %27 = vector.broadcast %cst_13 : f32 to vector<2x4x1xf32>
    %28 = arith.subf %27, %17 : vector<2x4x1xf32>
    %cst_14 = arith.constant 0.000000e+00 : f32
    %29 = vector.broadcast %cst_14 : f32 to vector<2x4x1xf32>
    %30 = arith.cmpf one, %17, %29 : vector<2x4x1xf32>
    %cst_15 = arith.constant 0.000000e+00 : f32
    %31 = vector.broadcast %cst_15 : f32 to vector<2x4x1xf32>
    %32 = arith.cmpf one, %17, %31 : vector<2x4x1xf32>
    %cst_16 = arith.constant 1.000000e+00 : f32
    %33 = vector.broadcast %cst_16 : f32 to vector<2x4x1xf32>
    %34 = arith.select %32, %17, %33 : vector<2x4x1xi1>, vector<2x4x1xf32>
    %35 = arith.divf %24, %34 : vector<2x4x1xf32>
    %36 = arith.select %30, %35, %24 : vector<2x4x1xi1>, vector<2x4x1xf32>
    %cst_17 = arith.constant 0.000000e+00 : f32
    %37 = vector.broadcast %cst_17 : f32 to vector<2x4x1xf32>
    %38 = arith.cmpf one, %28, %37 : vector<2x4x1xf32>
    %cst_18 = arith.constant 0.000000e+00 : f32
    %39 = vector.broadcast %cst_18 : f32 to vector<2x4x1xf32>
    %40 = arith.cmpf one, %28, %39 : vector<2x4x1xf32>
    %cst_19 = arith.constant 1.000000e+00 : f32
    %41 = vector.broadcast %cst_19 : f32 to vector<2x4x1xf32>
    %42 = arith.select %40, %28, %41 : vector<2x4x1xi1>, vector<2x4x1xf32>
    %43 = arith.divf %26, %42 : vector<2x4x1xf32>
    %44 = arith.select %38, %43, %26 : vector<2x4x1xi1>, vector<2x4x1xf32>
    %45 = arith.addf %36, %44 : vector<2x4x1xf32>
    %cst_20 = arith.constant dense<0.000000e+00> : vector<2x1xf32>
    %46 = vector.multi_reduction <add>, %45, %cst_20 [1] : vector<2x4x1xf32> to vector<2x1xf32>
    %47 = vector.shape_cast %46 : vector<2x1xf32> to vector<2x1x1xf32>
    %cst_21 = arith.constant 4.000000e+00 : f32
    %48 = vector.broadcast %cst_21 : f32 to vector<2x1x1xf32>
    %49 = arith.divf %47, %48 : vector<2x1x1xf32>
    %50 = vector.shape_cast %49 : vector<2x1x1xf32> to vector<2x1x1xf32>
    %51 = vector.broadcast %50 : vector<2x1x1xf32> to vector<2x8x128xf32>
    %c0_22 = arith.constant 0 : index
    %c0_23 = arith.constant 0 : index
    %c0_24 = arith.constant 0 : index
    %52 = vector.load %arg3[%c0_22, %c0_23, %c0_24] : memref<2x8x128xf32, #tpu.memory_space<vmem>>, vector<2x8x128xf32>
    tpu.vector_store %arg3[%c0_22, %c0_23, %c0_24], %51 {strides = array<i32>} : memref<2x8x128xf32, #tpu.memory_space<vmem>>, vector<2x8x128xf32>,
    return
  }
  func.func @transform_0(%arg0: i32) -> (i32, i32, i32) {
    %c0_i32 = arith.constant 0 : i32
    %c0_i32_0 = arith.constant 0 : i32
    %c0_i32_1 = arith.constant 0 : i32
    return %arg0, %c0_i32, %c0_i32_0 : i32, i32, i32
  }
  func.func @transform_1(%arg0: i32) -> (i32, i32, i32) {
    %c0_i32 = arith.constant 0 : i32
    %c0_i32_0 = arith.constant 0 : i32
    %c0_i32_1 = arith.constant 0 : i32
    return %arg0, %c0_i32, %c0_i32_0 : i32, i32, i32
  }
  func.func @transform_2(%arg0: i32) -> (i32, i32, i32) {
    %c0_i32 = arith.constant 0 : i32
    %c0_i32_0 = arith.constant 0 : i32
    %c0_i32_1 = arith.constant 0 : i32
    return %arg0, %c0_i32, %c0_i32_0 : i32, i32, i32
  }
}

</mosaic_0001>

<bundles_post_ra>
// kernel: tpu_custom_call.1
= control target key start
LH: loop header
LB: loop body
LE: loop exit
PB: predicated region body
PF: predicated region fallthrough
CT: control target
= control target key end

     0   :  { %7 = vsyncpa [#allocation3], 0  ;;  %s349_s0 = inlined_call_operand.hbm [shape: f32[2,4,256], index: 0, kind: input, shape index: {}]   ;;  %s350_s1 = inlined_call_operand.hbm [shape: f32[2,4,256], index: 1, kind: input, shape index: {}]   ;;  %s351_s2 = inlined_call_operand.hbm [shape: f32[2,8,128], index: 2, kind: output, shape index: {}]  }
   0x1   :  { %8 = vsyncpa [#allocation6], 0 }
   0x2   :  { %9 = vsyncpa [#allocation4], 0  ;;  %s273_s9 = smov [#allocation2]  }
   0x3   :  { %s15_s10 = sshll.u32 %s273_s9, 4  ;;  %s16_s10 = int_to_ptr.vmem [resolvable:$true] %s15_s10 }
   0x4   :  { %s215_s11 = scalar_lea.vmem %s16_s10, 256  ;;  %p220_p1 = scmp.lt.s32.totalorder %s16_s10, %s16_s10 }
   0x5   :  { %p216_p0 = scmp.ne.s32.totalorder %s16_s10, %s215_s11  ;;  %p221_p2 = scmp.lt.s32.totalorder %s215_s11, %s215_s11 }
   0x7   :  { %p222_p3 = por %p221_p2, %p220_p1 }
   0x9   :  { %p223_p4 = pnand %p222_p3, %p216_p0 }
   0xb   :  { %226 = shalt.err (!%p223_p4)
}
   0xc   :  { %s274_s12 = smov 128   ;;  %s275_s13 = smov 8  }
   0xd   :  { %21 = dma.hbm_to_vmem [thread:$0]  %s349_s0, 256, %s16_s10, [#allocation3], %s274_s12, %s274_s12, %s275_s13  }
   0xe   :  { %s276_s16 = smov [#allocation5]  }
   0xf   :  { %s27_s17 = sshll.u32 %s276_s16, 4  ;;  %s28_s17 = int_to_ptr.vmem [resolvable:$true] %s27_s17 }
  0x10   :  { %s235_s18 = scalar_lea.vmem %s28_s17, 256  ;;  %p240_p6 = scmp.lt.s32.totalorder %s28_s17, %s28_s17 }
  0x11   :  { %p236_p5 = scmp.ne.s32.totalorder %s28_s17, %s235_s18  ;;  %p241_p7 = scmp.lt.s32.totalorder %s235_s18, %s235_s18 }
  0x13   :  { %p242_p8 = por %p241_p7, %p240_p6 }
  0x15   :  { %p243_p9 = pnand %p242_p8, %p236_p5 }
  0x17   :  { %246 = shalt.err (!%p243_p9)
}
  0x18   :  { %33 = dma.hbm_to_vmem [thread:$0]  %s350_s1, 256, %s28_s17, [#allocation6], %s274_s12, %s274_s12, %s275_s13  }
  0x19   :  { %267 = dma.done.wait [#allocation3], 256  }
  0x1a   :  { %268 = vsyncadd [#allocation3], 4294967040 }
  0x1b   :  { %269 = dma.done.wait [#allocation6], 256  }
  0x1c   :  { %270 = vsyncadd [#allocation6], 4294967040  ;;  %v42_v0 = vld [vmem:[#allocation5] sm:$0xff]  ;;  %vm58_vm0 = vcmask 1043456   ;;  %v40_v1 = vld [vmem:[#allocation2] sm:$0xff]  ;;  %s277_s0 = smov [#allocation7]  }
  0x1d   :  { %v43_v2 = vld [vmem:[#allocation5 + $0x8] sm:$0xff]  ;;  %vm48_vm1 = vcmp.eq.f32.partialorder %v42_v0, %v42_v0  ;;  %vm44_vm2 = vcmp.eq.f32.partialorder %v40_v1, %v40_v1  ;;  %v41_v3 = vld [vmem:[#allocation2 + $0x8] sm:$0xff]  ;;  %s177_s1 = sshll.u32 %s277_s0, 4  ;;  %s178_s1 = int_to_ptr.vmem [resolvable:$true] %s177_s1 }
  0x1e   :  { %vm49_vm3 = vcmp.eq.f32.partialorder %v43_v2, %v43_v2  ;;  %v50_v4 = vsel %vm48_vm1, %v42_v0, 0.0  ;;  %v46_v5 = vsel %vm44_vm2, %v40_v1, 0.0  ;;  %vm45_vm4 = vcmp.eq.f32.partialorder %v41_v3, %v41_v3  ;;  %s247_s21 = scalar_lea.vmem %s178_s1, 256  ;;  %p252_p11 = scmp.lt.s32.totalorder %s178_s1, %s178_s1 }
  0x1f   :  { %v51_v6 = vsel %vm49_vm3, %v43_v2, 0.0  ;;  %v85_v7 = vcombine.high %v50_v4, %v50_v4  ;;  %v89_v8 = vsel %vm58_vm0, %v50_v4, 0.0  ;;  %v54_v9 = vcombine.high %v46_v5, %v46_v5  ;;  %p248_p10 = scmp.ne.s32.totalorder %s178_s1, %s247_s21  ;;  %p253_p12 = scmp.lt.s32.totalorder %s247_s21, %s247_s21 }
  0x20   :  { %v59_v10 = vsel %vm58_vm0, %v46_v5, -inf  ;;  %v86_v11 = vcombine.high %v51_v6, %v51_v6  ;;  %v94_v12 = vsel %vm58_vm0, %v51_v6, 0.0  ;;  %v47_v13 = vsel %vm45_vm4, %v41_v3, 0.0 }
  0x21   :  { %v90_v14 = vsel %vm58_vm0, %v85_v7, 0.0  ;;  %v60_v15 = vsel %vm58_vm0, %v54_v9, -inf  ;;  %v55_v16 = vcombine.high %v47_v13, %v47_v13  ;;  %v64_v17 = vsel %vm58_vm0, %v47_v13, -inf  ;;  %p254_p13 = por %p253_p12, %p252_p11 }
  0x22   :  { %v91_v18 = vadd.f32 %v90_v14, %v89_v8  ;;  %v61_v19 = vmax.f32 %v59_v10, %v60_v15  ;;  %v95_v20 = vsel %vm58_vm0, %v86_v11, 0.0  ;;  %v99_v24 = vmul.f32 %v50_v4, %v46_v5 }
  0x23   :  { %v96_v21 = vadd.f32 %v95_v20, %v94_v12  ;;  %v65_v22 = vsel %vm58_vm0, %v55_v16, -inf  ;;  %v100_v25 = vmul.f32 %v51_v6, %v47_v13  ;;  %v73_v26 = vsel %vm58_vm0, %v46_v5, 0.0  ;;  %p255_p0 = pnand %p254_p13, %p248_p10 }
  0x24   :  { %92 = vadd.xlane.f32.xlu1 %v91_v18  ;;  %62 = vmax.xlane.f32.xlu0 %v61_v19  ;;  %v66_v23 = vmax.f32 %v64_v17, %v65_v22  ;;  %v74_v27 = vsel %vm58_vm0, %v54_v9, 0.0  ;;  %v78_v28 = vsel %vm58_vm0, %v47_v13, 0.0  ;;  %v79_v29 = vsel %vm58_vm0, %v55_v16, 0.0 }
  0x25   :  { %v103_v30 = vcombine.high %v99_v24, %v99_v24  ;;  %v104_v31 = vcombine.high %v100_v25, %v100_v25  ;;  %v75_v32 = vadd.f32 %v74_v27, %v73_v26  ;;  %v80_v33 = vadd.f32 %v79_v29, %v78_v28 }
  0x26   :  { %v107_v34 = vsel %vm58_vm0, %v99_v24, 0.0  ;;  %v112_v36 = vsel %vm58_vm0, %v100_v25, 0.0 }
  0x27   :  { %v108_v35 = vsel %vm58_vm0, %v103_v30, 0.0  ;;  %v113_v37 = vsel %vm58_vm0, %v104_v31, 0.0 }
  0x28   :  { %97 = vadd.xlane.f32.xlu1 %v96_v21  ;;  %67 = vmax.xlane.f32.xlu0 %v66_v23  ;;  %v109_v38 = vadd.f32 %v108_v35, %v107_v34  ;;  %v114_v39 = vadd.f32 %v113_v37, %v112_v36 }
  0x2c   :  { %76 = vadd.xlane.f32.xlu0 %v75_v32  ;;  %81 = vadd.xlane.f32.xlu1 %v80_v33 }
  0x30   :  { %110 = vadd.xlane.f32.xlu0 %v109_v38  ;;  %115 = vadd.xlane.f32.xlu1 %v114_v39 }
  0xad   :  { %v93_v40 = vpop.xlane.xlu1 %92  ;;  %v63_v41 = vpop.xlane.xlu0 %62 }
  0xae   :  { %v129_v42 = vsub.f32 256.0, %v93_v40  ;;  %vm131_vm5 = vcmp.ne.f32.partialorder %v93_v40, 0.0  ;;  %vm69_vm6 = vcmp.eq.f32.partialorder %v63_v41, 0.0 }
  0xaf   :  { %v71_v43 = vsel %vm69_vm6, 1e-07, %v63_v41  ;;  %v133_v45 = vsel %vm131_vm5, %v93_v40, 1.0 }
  0xb0   :  { %vm321_vm7 = vcmp.ne.f32.partialorder %v129_v42, 0.0  ;;  %195 = vrcp.f32 %v71_v43 }
  0xb1   :  { %v143_v46 = vsel %vm321_vm7, %v129_v42, 1.0  ;;  %v98_v47 = vpop.xlane.xlu1 %97  ;;  %v68_v48 = vpop.xlane.xlu0 %67 }
  0xb2   :  { %197 = vrcp.f32 %v143_v46  ;;  %v130_v49 = vsub.f32 256.0, %v98_v47  ;;  %vm70_vm8 = vcmp.eq.f32.partialorder %v68_v48, 0.0  ;;  %vm132_vm9 = vcmp.ne.f32.partialorder %v98_v47, 0.0 }
  0xb3   :  { %v72_v50 = vsel %vm70_vm8, 1e-07, %v68_v48  ;;  %199 = vrcp.f32 %v133_v45  ;;  %v134_v54 = vsel %vm132_vm9, %v98_v47, 1.0 }
  0xb4   :  { %vm328_vm10 = vcmp.ne.f32.partialorder %v130_v49, 0.0  ;;  %201 = vrcp.f32 %v72_v50 }
  0xb5   :  { %v144_v52 = vsel %vm328_vm10, %v130_v49, 1.0  ;;  %v77_v53 = vpop.xlane.xlu0 %76  ;;  %v82_v55 = vpop.xlane.xlu1 %81 }
  0xb6   :  { %203 = vrcp.f32 %v144_v52 }
  0xb7   :  { %205 = vrcp.f32 %v134_v54 }
  0xb9   :  { %v111_v56 = vpop.xlane.xlu0 %110  ;;  %v116_v59 = vpop.xlane.xlu1 %115 }
  0xba   :  { %v125_v57 = vsub.f32 %v77_v53, %v111_v56  ;;  %v126_v2 = vsub.f32 %v82_v55, %v116_v59 }
  0xbd   :  { %v196_v58 = vpop.eup %195 }
  0xbe   :  { %v121_v61 = vmul.f32 %v196_v58, %v111_v56  ;;  %v127_v62 = vmul.f32 %v196_v58, %v125_v57 }
  0xbf   :  { %v198_v60 = vpop.eup %197 }
  0xc0   :  { %v200_v63 = vpop.eup %199  ;;  %v123_v0 = vsub.f32 %v93_v40, %v121_v61  ;;  %v146_v1 = vmul.f32 %v198_v60, %v127_v62 }
  0xc1   :  { %v202_v3 = vpop.eup %201 }
  0xc2   :  { %v136_v5 = vmul.f32 %v200_v63, %v123_v0  ;;  %v122_v6 = vmul.f32 %v202_v3, %v116_v59  ;;  %v128_v7 = vmul.f32 %v202_v3, %v126_v2  ;;  %v149_v9 = vsel %vm321_vm7, %v146_v1, %v127_v62 }
  0xc3   :  { %v204_v4 = vpop.eup %203 }
  0xc4   :  { %v139_v8 = vsel %vm131_vm5, %v136_v5, %v123_v0  ;;  %v124_v10 = vsub.f32 %v98_v47, %v122_v6  ;;  %v148_v11 = vmul.f32 %v204_v4, %v128_v7  ;;  %v206_v12 = vpop.eup %205 }
  0xc5   :  { %v151_v13 = vadd.f32 %v149_v9, %v139_v8 }
  0xc6   :  { %v138_v14 = vmul.f32 %v206_v12, %v124_v10  ;;  %v150_v18 = vsel %vm328_vm10, %v148_v11, %v128_v7 }
  0xc7   :  { %v153_v15 = vsel %vm58_vm0, %v151_v13, 0.0 }
  0xc8   :  { %v154_v16 = vrot.slane %v153_v15, 4  ;;  %v140_v17 = vsel %vm132_vm9, %v138_v14, %v124_v10 }
  0xc9   :  { %v152_v19 = vadd.f32 %v150_v18, %v140_v17 }
  0xca   :  { %v155_v20 = vadd.f32 %v154_v16, %v153_v15 }
  0xcb   :  { %v160_v21 = vsel %vm58_vm0, %v152_v19, 0.0 }
  0xcc   :  { %v161_v22 = vrot.slane %v160_v21, 4  ;;  %v156_v23 = vrot.slane %v155_v20, 2 }
  0xce   :  { %v157_v24 = vadd.f32 %v156_v23, %v155_v20  ;;  %v162_v25 = vadd.f32 %v161_v22, %v160_v21 }
  0xd0   :  { %v158_v26 = vrot.slane %v157_v24, 1  ;;  %v163_v27 = vrot.slane %v162_v25, 2 }
  0xd2   :  { %v159_v28 = vadd.f32 %v158_v26, %v157_v24  ;;  %v164_v29 = vadd.f32 %v163_v27, %v162_v25 }
  0xd4   :  { %v165_v30 = vrot.slane %v164_v29, 1  ;;  %v168_v31 = vmul.f32 0.25, %v159_v28 }
  0xd6   :  { %v166_v32 = vadd.f32 %v165_v30, %v164_v29  ;;  %170 = vst [vmem:[#allocation7] sm:$0xff] %v168_v31 }
  0xd8   :  { %v169_v33 = vmul.f32 0.25, %v166_v32 }
  0xda   :  { %171 = vst [vmem:[#allocation7 + $0x8] sm:$0xff] %v169_v33 }
  0xdb   :  { %258 = shalt.err (!%p255_p0)
}
  0xdc   :  { %183 = dma.vmem_to_hbm [thread:$0]  %s178_s1, 256, %s351_s2, [#allocation4], %s274_s12, %s274_s12, %s275_s13  }
  0xdd   :  { %271 = dma.done.wait [#allocation4], 256  }
  0xde   :  { %272 = vsyncadd [#allocation4], 4294967040 }
  0xdf   :  { %187 = vsyncpa [#allocation3], 1 }
  0xe0   :  { %188 = vsyncpa [#allocation6], 1 }
  0xe1   :  { %189 = vsyncpa [#allocation4], 1 }

</bundles_post_ra>
